<compile_context>
chip_gen: v6e
topology: v6e:2x2x1
jax: 0.10.0
libtpu: 0.0.40
codegen_flags: <defaults>
</compile_context>

<pallas_src>
import functools

import numpy as np
import jax
import jax.numpy as jnp
from jax.experimental import pallas as pl
from jax.experimental.pallas import tpu as pltpu

# Global flags (mirrors the module-level USE_tracking / USE_conn_tracker
# globals referenced by the PyTorch forward).
USE_tracking = True
USE_conn_tracker = True

# Rows appended to the stacked activation for the folded bias (row 0 = ones,
# rest = zeros).  16 keeps the bf16 sublane packing aligned.
_BIAS_PAD = 16


def _make_reducer_kernel(n_extra, hidden_size, bias_pad=_BIAS_PAD):
    """Fused projection (single K-deep MXU dot) + tree-LSTM cell update.

    Ref layout is feature-major: features on sublanes, batch on lanes.
      left_ref/right_ref : (2H, TB)      [h ; c] stacked along features
      extra refs         : (H, TB)       tracker / conn-tracker hidden states
      wf_ref             : (5H, K)       fused weight [W | bias | 0], bf16
      out_ref            : (2H, TB)      [h ; c]
      x_sc (scratch)     : (K, TB)       stacked bf16 activations + ones row
    with K = (2 + n_extra) * H + bias_pad.
    """
    H = hidden_size
    n_seg = 2 + n_extra

    def kernel(*refs):
        left_ref, right_ref = refs[0], refs[1]
        extra_refs = refs[2:2 + n_extra]
        wf_ref = refs[2 + n_extra]
        out_ref = refs[3 + n_extra]
        x_sc = refs[4 + n_extra]

        dt = x_sc.dtype
        tb = x_sc.shape[1]
        nsH = n_seg * H

        # Fused "concat": stack the h-segments into one bf16 slab so the
        # projection is a single K-deep MXU contraction instead of n_seg
        # separate K=H dots plus an f32 (5H,TB) add chain.
        x_sc[0:H, :] = left_ref[:H, :].astype(dt)
        x_sc[H:2 * H, :] = right_ref[:H, :].astype(dt)
        for j, er in enumerate(extra_refs):
            x_sc[(2 + j) * H:(3 + j) * H, :] = er[...].astype(dt)

        # Folded bias: row nsH is all-ones, remaining pad rows are zero.
        # Rewritten every step (cheap) so it stays correct when the parallel
        # batch axis is sharded across v7x TensorCores (no pid==0 init).
        row = jax.lax.broadcasted_iota(jnp.int32, (bias_pad, tb), 0)
        x_sc[nsH:nsH + bias_pad, :] = (row == 0).astype(dt)

        # One fused projection: (5H, K) @ (K, TB) -> (5H, TB), f32 accumulate.
        y = jnp.dot(wf_ref[...], x_sc[...], preferred_element_type=jnp.float32)

        c1 = left_ref[H:, :].astype(jnp.float32)
        c2 = right_ref[H:, :].astype(jnp.float32)

        # chunk(5) along the feature (sublane) axis — H % 8 == 0 keeps these
        # vreg-aligned sublane slices.
        g = y[0 * H:1 * H, :]
        i = y[1 * H:2 * H, :]
        f1 = y[2 * H:3 * H, :]
        f2 = y[3 * H:4 * H, :]
        o = y[4 * H:5 * H, :]

        c = (jnp.tanh(g) * jax.nn.sigmoid(i)
             + jax.nn.sigmoid(f1) * c1
             + jax.nn.sigmoid(f2) * c2)
        h = jax.nn.sigmoid(o) * jnp.tanh(c)

        # Lane-dense stores; no concat relayout.
        out_ref[:H, :] = h.astype(out_ref.dtype)
        out_ref[H:, :] = c.astype(out_ref.dtype)

    return kernel


def _choose_tb(B, block_b, per_lane_bytes, resident_bytes):
    """Batch-tile width: multiple of 128, VMEM-budgeted, and >= 2 grid blocks
    whenever B > 128 so v7x megacore can shard the parallel batch axis."""
    if B <= 128:
        return B
    # Leave headroom under the scoped VMEM limit for the resident weights.
    # TODO(synk): for very large H where the resident weight exceeds the
    # budget, add a second grid axis over the 5 gate blocks instead of
    # shrinking TB.
    budget = 24 * 2**20 - resident_bytes
    cap = max(128, (budget // max(per_lane_bytes, 1)) // 128 * 128)
    half = ((B + 1) // 2 + 127) // 128 * 128      # ceil(B/2), lane-rounded
    tb = min(block_b, cap, half)
    return max(128, tb // 128 * 128)


@functools.partial(jax.jit, static_argnames=("block_b", "out_dtype"))
def _reduce_batched(left_T, right_T, extras, w_fused, *, block_b=2048,
                    out_dtype=jnp.float32):
    """left_T/right_T: (2H, B); extras: tuple of (H, B); returns (2H, B)."""
    H = left_T.shape[0] // 2
    B = left_T.shape[1]
    n_extra = len(extras)
    K = w_fused.shape[1]
    assert K == (2 + n_extra) * H + _BIAS_PAD
    assert H % 8 == 0

    in_it = left_T.dtype.itemsize
    out_it = np.dtype(out_dtype).itemsize
    w_it = w_fused.dtype.itemsize

    # VMEM bytes per batch lane: double-buffered inputs/outputs + scratch col.
    per_lane = (2 * in_it * (4 * H + n_extra * H)
                + 2 * out_it * 2 * H
                + w_it * K)
    resident = 2 * w_it * 5 * H * K   # weight (default double buffering)

    TB = _choose_tb(B, block_b, per_lane, resident)
    n_blk = pl.cdiv(B, TB)            # ragged tail is masked by Pallas; no pad

    footprint = resident + TB * per_lane + (1 << 20)
    vmem_limit = (None if footprint <= 12 * 2**20
                  else min(footprint * 3 // 2, 48 * 2**20))

    kernel = _make_reducer_kernel(n_extra, H)

    def act_spec(rows):
        return pl.BlockSpec((rows, TB), lambda bi: (0, bi))

    # Constant block index => fused weight stays VMEM-resident across the grid.
    w_spec = pl.BlockSpec((5 * H, K), lambda bi: (0, 0))

    in_specs = ([act_spec(2 * H), act_spec(2 * H)]
                + [act_spec(H)] * n_extra
                + [w_spec])

    out = pl.pallas_call(
        kernel,
        out_shape=jax.ShapeDtypeStruct((2 * H, B), out_dtype),
        grid=(n_blk,),
        in_specs=in_specs,
        out_specs=pl.BlockSpec((2 * H, TB), lambda bi: (0, bi)),
        scratch_shapes=[pltpu.VMEM((K, TB), w_fused.dtype)],
        compiler_params=pltpu.CompilerParams(
            dimension_semantics=("parallel",),
            vmem_limit_bytes=vmem_limit),
    )(left_T, right_T, *extras, w_fused)
    return out


class ReducerPallas:
    """JAX/Pallas port of parser_model.reducer.Reducer (batched, feature-major)."""

    def __init__(self, hidden_size, key, mxu_dtype=jnp.bfloat16):
        # Keep MXU inputs bf16 on every generation (f32 accumulation); f32
        # operands would need multi-pass matmuls (especially slow on v5e).
        assert hidden_size % 8 == 0, "hidden_size must be a multiple of 8"
        # TODO(synk): pad hidden_size to a multiple of 8 if unaligned H is ever needed.
        self.hidden_size = hidden_size
        self.mxu_dtype = mxu_dtype
        H = hidden_size
        k = jax.random.split(key, 6)
        scale = 0.1

        def make_linear(kw, kb, in_dim):
            # torch nn.Linear layout: W (out_features, in_features), b (out_features,)
            W = scale * jax.random.normal(kw, (5 * H, in_dim), jnp.float32)
            b = scale * jax.random.normal(kb, (5 * H,), jnp.float32)
            # Fused kernel weight [W | bias | 0-pad], K = in_dim + _BIAS_PAD,
            # so the kernel's single dot also applies the bias (ones row).
            pad = jnp.zeros((5 * H, _BIAS_PAD - 1), jnp.float32)
            Wf = jnp.concatenate([W, b[:, None], pad], axis=1).astype(mxu_dtype)
            return W, b, Wf

        (self.W_tracking_all, self.b_tracking_all,
         self.Wf_tracking_all) = make_linear(k[0], k[1], 4 * H)
        (self.W_tracking, self.b_tracking,
         self.Wf_tracking) = make_linear(k[2], k[3], 3 * H)
        (self.W_proj, self.b_proj, self.Wf_proj) = make_linear(k[4], k[5], 2 * H)

    # ---- flag-dependent parameter / segment selection ------------------------
    # NOTE: the conn-tracker-only branch intentionally reuses proj_tracking,
    # exactly as the PyTorch forward does (`elif USE_conn_tracker: self.proj_tracking(...)`).
    def _select(self, e_h_T, c_h_T):
        if USE_tracking and USE_conn_tracker:
            return ((e_h_T, c_h_T), self.Wf_tracking_all,
                    (self.W_tracking_all, self.b_tracking_all))
        elif USE_tracking:
            return (e_h_T,), self.Wf_tracking, (self.W_tracking, self.b_tracking)
        elif USE_conn_tracker:
            return (c_h_T,), self.Wf_tracking, (self.W_tracking, self.b_tracking)
        else:
            return (), self.Wf_proj, (self.W_proj, self.b_proj)

    # ---- batched forward (feature-major layout) -------------------------------
    def reduce_batch(self, left_T, right_T, e_h_T=None, c_h_T=None, *,
                     block_b=2048, out_dtype=jnp.float32):
        """left_T/right_T: (2H, B); e_h_T/c_h_T: (H, B). Returns (2H, B) = [h; c]."""
        extras, w_fused, _ = self._select(e_h_T, c_h_T)
        return _reduce_batched(left_T, right_T, extras, w_fused,
                               block_b=block_b, out_dtype=out_dtype)

    # ---- pure-JAX f32 reference (true f32 weights, for correctness checks) ---
    def reference_batch(self, left_T, right_T, e_h_T=None, c_h_T=None):
        H = self.hidden_size
        extras, _, (W, b) = self._select(e_h_T, c_h_T)
        h1, c1 = left_T[:H], left_T[H:]
        h2, c2 = right_T[:H], right_T[H:]
        x = jnp.concatenate((h1, h2) + tuple(extras), axis=0)
        y = W @ x + b[:, None]
        g, i, f1, f2, o = (y[j * H:(j + 1) * H] for j in range(5))
        c = (jnp.tanh(g) * jax.nn.sigmoid(i)
             + jax.nn.sigmoid(f1) * c1 + jax.nn.sigmoid(f2) * c2)
        h = jax.nn.sigmoid(o) * jnp.tanh(c)
        return jnp.concatenate([h, c], axis=0)

    # ---- single-node forward, same signature as the PyTorch module ------------
    # NOTE: B=1 means a lane width of 1 (masked stores, idle MXU) plus full
    # pallas_call overhead per tree node — batch same-depth reduces and call
    # reduce_batch in hot loops.
    def __call__(self, left, right, tracking, conn_tracking):
        H = self.hidden_size
        e_h, _e_c = tracking
        c_h, _c_c = conn_tracking
        left_T = left.reshape(2 * H, 1).astype(jnp.float32)
        right_T = right.reshape(2 * H, 1).astype(jnp.float32)
        e_h_T = None if e_h is None else jnp.reshape(e_h, (H, 1)).astype(jnp.float32)
        c_h_T = None if c_h is None else jnp.reshape(c_h, (H, 1)).astype(jnp.float32)
        out = self.reduce_batch(left_T, right_T, e_h_T, c_h_T)
        return out.reshape(2 * H)   # cat([h, c]), matches the torch output


if __name__ == "__main__":
    H = 32
    B = 256  # number of reduce ops batched together
    key = jax.random.PRNGKey(0)
    (k_param, k_left, k_right, k_eh, k_ch,
     k_l1, k_r1, k_eh1, k_ec1, k_ch1, k_cc1) = jax.random.split(key, 11)

    reducer = ReducerPallas(H, k_param)

    # Batched, feature-major inputs: features on sublanes, batch on lanes.
    left_T = jax.random.normal(k_left, (2 * H, B), jnp.float32)
    right_T = jax.random.normal(k_right, (2 * H, B), jnp.float32)
    e_h_T = jax.random.normal(k_eh, (H, B), jnp.float32)
    c_h_T = jax.random.normal(k_ch, (H, B), jnp.float32)

    out = jax.block_until_ready(
        reducer.reduce_batch(left_T, right_T, e_h_T, c_h_T))
    assert out.shape == (2 * H, B)

    ref = jax.block_until_ready(
        reducer.reference_batch(left_T, right_T, e_h_T, c_h_T))
    max_err = float(jnp.max(jnp.abs(out - ref)))
    assert jnp.allclose(out, ref, atol=5e-2, rtol=5e-2), max_err

    # Single-node path (PyTorch forward signature).
    left1 = jax.random.normal(k_l1, (2 * H,), jnp.float32)
    right1 = jax.random.normal(k_r1, (2 * H,), jnp.float32)
    tracking = (jax.random.normal(k_eh1, (1, H), jnp.float32),
                jax.random.normal(k_ec1, (1, H), jnp.float32))
    conn_tracking = (jax.random.normal(k_ch1, (1, H), jnp.float32),
                     jax.random.normal(k_cc1, (1, H), jnp.float32))
    out1 = jax.block_until_ready(reducer(left1, right1, tracking, conn_tracking))
    assert out1.shape == (2 * H,)
    ref1 = reducer.reference_batch(
        left1.reshape(2 * H, 1), right1.reshape(2 * H, 1),
        jnp.reshape(tracking[0], (H, 1)),
        jnp.reshape(conn_tracking[0], (H, 1))).reshape(2 * H)
    assert jnp.allclose(out1, ref1, atol=5e-2, rtol=5e-2)

    print("KERNEL_OK")
</pallas_src>

<mosaic_0001>
module attributes {stable_mosaic.version = 11 : i64} {
  func.func @kernel(%arg0: i32, %arg1: memref<64x128xf32, #tpu.memory_space<vmem>>, %arg2: memref<64x128xf32, #tpu.memory_space<vmem>>, %arg3: memref<32x128xf32, #tpu.memory_space<vmem>>, %arg4: memref<32x128xf32, #tpu.memory_space<vmem>>, %arg5: memref<160x144xbf16, #tpu.memory_space<vmem>>, %arg6: memref<64x128xf32, #tpu.memory_space<vmem>>, %arg7: memref<144x128xbf16, #tpu.memory_space<vmem>>) attributes {dimension_semantics = [#tpu.dimension_semantics<parallel>], iteration_bounds = array<i64: 2>, scalar_prefetch = 0 : i64, scratch_operands = 1 : i64, tpu.core_type = #tpu.core_type<tc>, window_params = [{transform_indices = @transform_0, window_bounds = array<i64: 64, 128>}, {transform_indices = @transform_1, window_bounds = array<i64: 64, 128>}, {transform_indices = @transform_2, window_bounds = array<i64: 32, 128>}, {transform_indices = @transform_3, window_bounds = array<i64: 32, 128>}, {pipeline_mode = #tpu.pipeline_mode<synchronous>, transform_indices = @transform_4, window_bounds = array<i64: 160, 144>}, {transform_indices = @transform_5, window_bounds = array<i64: 64, 128>}]} {
    %c0 = arith.constant 0 : index
    %c0_0 = arith.constant 0 : index
    %0 = vector.load %arg1[%c0, %c0_0] : memref<64x128xf32, #tpu.memory_space<vmem>>, vector<32x128xf32>
    %1 = arith.truncf %0 : vector<32x128xf32> to vector<32x128xbf16>
    %c0_1 = arith.constant 0 : index
    %c0_2 = arith.constant 0 : index
    %2 = vector.load %arg7[%c0_1, %c0_2] : memref<144x128xbf16, #tpu.memory_space<vmem>>, vector<32x128xbf16>
    tpu.vector_store %arg7[%c0_1, %c0_2], %1 {strides = array<i32>} : memref<144x128xbf16, #tpu.memory_space<vmem>>, vector<32x128xbf16>,
    %c0_3 = arith.constant 0 : index
    %c0_4 = arith.constant 0 : index
    %3 = vector.load %arg2[%c0_3, %c0_4] : memref<64x128xf32, #tpu.memory_space<vmem>>, vector<32x128xf32>
    %4 = arith.truncf %3 : vector<32x128xf32> to vector<32x128xbf16>
    %c32 = arith.constant 32 : index
    %c0_5 = arith.constant 0 : index
    %5 = vector.load %arg7[%c32, %c0_5] : memref<144x128xbf16, #tpu.memory_space<vmem>>, vector<32x128xbf16>
    tpu.vector_store %arg7[%c32, %c0_5], %4 {strides = array<i32>} : memref<144x128xbf16, #tpu.memory_space<vmem>>, vector<32x128xbf16>,
    %c0_6 = arith.constant 0 : index
    %c0_7 = arith.constant 0 : index
    %6 = vector.load %arg3[%c0_6, %c0_7] : memref<32x128xf32, #tpu.memory_space<vmem>>, vector<32x128xf32>
    %7 = arith.truncf %6 : vector<32x128xf32> to vector<32x128xbf16>
    %c64 = arith.constant 64 : index
    %c0_8 = arith.constant 0 : index
    %8 = vector.load %arg7[%c64, %c0_8] : memref<144x128xbf16, #tpu.memory_space<vmem>>, vector<32x128xbf16>
    tpu.vector_store %arg7[%c64, %c0_8], %7 {strides = array<i32>} : memref<144x128xbf16, #tpu.memory_space<vmem>>, vector<32x128xbf16>,
    %c0_9 = arith.constant 0 : index
    %c0_10 = arith.constant 0 : index
    %9 = vector.load %arg4[%c0_9, %c0_10] : memref<32x128xf32, #tpu.memory_space<vmem>>, vector<32x128xf32>
    %10 = arith.truncf %9 : vector<32x128xf32> to vector<32x128xbf16>
    %c96 = arith.constant 96 : index
    %c0_11 = arith.constant 0 : index
    %11 = vector.load %arg7[%c96, %c0_11] : memref<144x128xbf16, #tpu.memory_space<vmem>>, vector<32x128xbf16>
    tpu.vector_store %arg7[%c96, %c0_11], %10 {strides = array<i32>} : memref<144x128xbf16, #tpu.memory_space<vmem>>, vector<32x128xbf16>,
    %12 = tpu.iota {dimensions = array<i32: 0>} : vector<16x128xi32>
    %c0_i32 = arith.constant 0 : i32
    %13 = vector.broadcast %c0_i32 : i32 to vector<16x128xi32>
    %14 = arith.cmpi eq, %12, %13 : vector<16x128xi32>
    %15 = arith.extui %14 : vector<16x128xi1> to vector<16x128xi32>
    %16 = arith.sitofp %15 : vector<16x128xi32> to vector<16x128xf32>
    %17 = arith.truncf %16 : vector<16x128xf32> to vector<16x128xbf16>
    %c128 = arith.constant 128 : index
    %c0_12 = arith.constant 0 : index
    %18 = vector.load %arg7[%c128, %c0_12] : memref<144x128xbf16, #tpu.memory_space<vmem>>, vector<16x128xbf16>
    tpu.vector_store %arg7[%c128, %c0_12], %17 {strides = array<i32>} : memref<144x128xbf16, #tpu.memory_space<vmem>>, vector<16x128xbf16>,
    %c0_13 = arith.constant 0 : index
    %c0_14 = arith.constant 0 : index
    %19 = vector.load %arg5[%c0_13, %c0_14] : memref<160x144xbf16, #tpu.memory_space<vmem>>, vector<160x144xbf16>
    %c0_15 = arith.constant 0 : index
    %c0_16 = arith.constant 0 : index
    %20 = vector.load %arg7[%c0_15, %c0_16] : memref<144x128xbf16, #tpu.memory_space<vmem>>, vector<144x128xbf16>
    %cst = arith.constant dense<0.000000e+00> : vector<160x128xf32>
    %21 = tpu.matmul %19, %20, %cst {dimension_numbers = #tpu.dot_dimension_numbers<[1], [0], [0], [1], [0, 0, 1, 1], [], []>} : vector<160x144xbf16>, vector<144x128xbf16>, vector<160x128xf32> -> vector<160x128xf32>
    %c32_17 = arith.constant 32 : index
    %c0_18 = arith.constant 0 : index
    %22 = vector.load %arg1[%c32_17, %c0_18] : memref<64x128xf32, #tpu.memory_space<vmem>>, vector<32x128xf32>
    %c32_19 = arith.constant 32 : index
    %c0_20 = arith.constant 0 : index
    %23 = vector.load %arg2[%c32_19, %c0_20] : memref<64x128xf32, #tpu.memory_space<vmem>>, vector<32x128xf32>
    %24 = vector.extract_strided_slice %21 {offsets = [0, 0], sizes = [32, 128], strides = [1, 1]} : vector<160x128xf32> to vector<32x128xf32>
    %25 = vector.extract_strided_slice %21 {offsets = [32, 0], sizes = [32, 128], strides = [1, 1]} : vector<160x128xf32> to vector<32x128xf32>
    %26 = vector.extract_strided_slice %21 {offsets = [64, 0], sizes = [32, 128], strides = [1, 1]} : vector<160x128xf32> to vector<32x128xf32>
    %27 = vector.extract_strided_slice %21 {offsets = [96, 0], sizes = [32, 128], strides = [1, 1]} : vector<160x128xf32> to vector<32x128xf32>
    %28 = vector.extract_strided_slice %21 {offsets = [128, 0], sizes = [32, 128], strides = [1, 1]} : vector<160x128xf32> to vector<32x128xf32>
    %29 = math.tanh %24 : vector<32x128xf32>
    %30 = arith.negf %25 : vector<32x128xf32>
    %31 = math.exp %30 : vector<32x128xf32>
    %cst_21 = arith.constant 1.000000e+00 : f32
    %32 = vector.broadcast %cst_21 : f32 to vector<32x128xf32>
    %33 = arith.addf %32, %31 : vector<32x128xf32>
    %34 = arith.divf %32, %33 : vector<32x128xf32>
    %35 = arith.mulf %29, %34 : vector<32x128xf32>
    %36 = arith.negf %26 : vector<32x128xf32>
    %37 = math.exp %36 : vector<32x128xf32>
    %cst_22 = arith.constant 1.000000e+00 : f32
    %38 = vector.broadcast %cst_22 : f32 to vector<32x128xf32>
    %39 = arith.addf %38, %37 : vector<32x128xf32>
    %40 = arith.divf %38, %39 : vector<32x128xf32>
    %41 = arith.mulf %40, %22 : vector<32x128xf32>
    %42 = arith.addf %35, %41 : vector<32x128xf32>
    %43 = arith.negf %27 : vector<32x128xf32>
    %44 = math.exp %43 : vector<32x128xf32>
    %cst_23 = arith.constant 1.000000e+00 : f32
    %45 = vector.broadcast %cst_23 : f32 to vector<32x128xf32>
    %46 = arith.addf %45, %44 : vector<32x128xf32>
    %47 = arith.divf %45, %46 : vector<32x128xf32>
    %48 = arith.mulf %47, %23 : vector<32x128xf32>
    %49 = arith.addf %42, %48 : vector<32x128xf32>
    %50 = arith.negf %28 : vector<32x128xf32>
    %51 = math.exp %50 : vector<32x128xf32>
    %cst_24 = arith.constant 1.000000e+00 : f32
    %52 = vector.broadcast %cst_24 : f32 to vector<32x128xf32>
    %53 = arith.addf %52, %51 : vector<32x128xf32>
    %54 = arith.divf %52, %53 : vector<32x128xf32>
    %55 = math.tanh %49 : vector<32x128xf32>
    %56 = arith.mulf %54, %55 : vector<32x128xf32>
    %c0_25 = arith.constant 0 : index
    %c0_26 = arith.constant 0 : index
    %57 = vector.load %arg6[%c0_25, %c0_26] : memref<64x128xf32, #tpu.memory_space<vmem>>, vector<32x128xf32>
    tpu.vector_store %arg6[%c0_25, %c0_26], %56 {strides = array<i32>} : memref<64x128xf32, #tpu.memory_space<vmem>>, vector<32x128xf32>,
    %c32_27 = arith.constant 32 : index
    %c0_28 = arith.constant 0 : index
    %58 = vector.load %arg6[%c32_27, %c0_28] : memref<64x128xf32, #tpu.memory_space<vmem>>, vector<32x128xf32>
    tpu.vector_store %arg6[%c32_27, %c0_28], %49 {strides = array<i32>} : memref<64x128xf32, #tpu.memory_space<vmem>>, vector<32x128xf32>,
    return
  }
  func.func @transform_0(%arg0: i32) -> (i32, i32) {
    %c0_i32 = arith.constant 0 : i32
    %c0_i32_0 = arith.constant 0 : i32
    return %c0_i32, %arg0 : i32, i32
  }
  func.func @transform_1(%arg0: i32) -> (i32, i32) {
    %c0_i32 = arith.constant 0 : i32
    %c0_i32_0 = arith.constant 0 : i32
    return %c0_i32, %arg0 : i32, i32
  }
  func.func @transform_2(%arg0: i32) -> (i32, i32) {
    %c0_i32 = arith.constant 0 : i32
    %c0_i32_0 = arith.constant 0 : i32
    return %c0_i32, %arg0 : i32, i32
  }
  func.func @transform_3(%arg0: i32) -> (i32, i32) {
    %c0_i32 = arith.constant 0 : i32
    %c0_i32_0 = arith.constant 0 : i32
    return %c0_i32, %arg0 : i32, i32
  }
  func.func @transform_4(%arg0: i32) -> (i32, i32) {
    %c0_i32 = arith.constant 0 : i32
    %c0_i32_0 = arith.constant 0 : i32
    %c0_i32_1 = arith.constant 0 : i32
    return %c0_i32, %c0_i32_0 : i32, i32
  }
  func.func @transform_5(%arg0: i32) -> (i32, i32) {
    %c0_i32 = arith.constant 0 : i32
    %c0_i32_0 = arith.constant 0 : i32
    return %c0_i32, %arg0 : i32, i32
  }
}

</mosaic_0001>

<bundles_post_ra>
// kernel: _reduce_batched.1
= control target key start
LH: loop header
LB: loop body
LE: loop exit
PB: predicated region body
PF: predicated region fallthrough
CT: control target
= control target key end

     0   :  { %s2051_s0 = inlined_call_operand.vmem [shape: f32[64,256], index: 0, kind: input, shape index: {}]   ;;  %s2052_s1 = inlined_call_operand.vmem [shape: f32[64,256], index: 1, kind: input, shape index: {}]   ;;  %s2053_s2 = inlined_call_operand.hbm [shape: f32[32,256], index: 2, kind: input, shape index: {}]   ;;  %s2054_s3 = inlined_call_operand.hbm [shape: f32[32,256], index: 3, kind: input, shape index: {}]   ;;  %s2055_s4 = inlined_call_operand.vmem [shape: bf16[160,144], index: 4, kind: input, shape index: {}]   ;;  %s2056_s5 = inlined_call_operand.hbm [shape: f32[64,256], index: 5, kind: output, shape index: {}]  }
   0x1   :  { %2059 = sst [smem:[#allocation14_spill]] %s2051_s0 }
   0x2   :  { %2060 = sst [smem:[#allocation15_spill]] %s2052_s1 }
   0x3   :  { %10 = vsyncpa [#allocation6], 0 }
   0x4   :  { %12 = vsyncpa [#allocation6 + $0x1], 0 }
   0x5   :  { %13 = vsyncpa [#allocation9], 0 }
   0x6   :  { %15 = vsyncpa [#allocation9 + $0x1], 0 }
   0x7   :  { %16 = vsyncpa [#allocation7], 0 }
   0x8   :  { %18 = vsyncpa [#allocation7 + $0x1], 0  ;;  %s1699_s18 = smov 0   ;;  %s1701_s19 = smov 0  }
   0x9   :  { %s1703_s20 = smov 0   ;;  %s1705_s21 = smov 0  }
   0xa LB: > { %s1720_s22 = sadd.s32 4294967295, %s1654_s21   ;;  %s1188_s23 = sadd.s32 4294967294, %s1654_s21   ;;  %s1654_s21 = sphi %s1705_s21, %s2073_s21   ;;  %s1650_s20 = sphi %s1703_s20, %s2072_s20   ;;  %s1646_s19 = sphi %s1701_s19, %s2071_s19   ;;  %s1642_s18 = sphi %s1699_s18, %s2070_s18  }
   0xb   : > { %s1724_s24 = sadd.s32 1, %s1654_s21   ;;  %s31_s25 = sadd.s32 1, %s1650_s20 }
   0xc   : > { %s28_s26 = ssub.s32 %s1654_s21, %s1724_s24  ;;  %p38_p0 = scmp.ne.s32.totalorder %s1650_s20, %s1646_s19 }
   0xd   : > { %p29_p1 = scmp.eq.s32.totalorder %s28_s26, 0  ;;  %p39_p2 = scmp.eq.s32.totalorder %s1654_s21, 0 }
   0xe   : > { %p96_p3 = scmp.ne.s32.totalorder %s1646_s19, %s1642_s18  ;;  %p97_p4 = scmp.eq.s32.totalorder %s1720_s22, 0 }
   0xf   : > { %s1736_s27 = scalar_select %p29_p1, %s1650_s20, %s31_s25  }
  0x10   : > { %p1738_p5 = por %p39_p2, %p38_p0  ;;  %p1742_p6 = por %p97_p4, %p96_p3 }
  0x11   : > { %p167_p7 = scmp.eq.s32.totalorder %s1720_s22, 1  ;;  %p173_p8 = scmp.eq.s32.totalorder %s1188_s23, 1 }
  0x12   : > { %p2057_p11 = scmp.ge.s32.totalorder %s1654_s21, 2 }
  0x13   : > { %p1747_p9 = por %p167_p7, %p38_p0  ;;  %p1751_p10 = por %p173_p8, %p96_p3 }
  0x14   : > { %192 = sbr.rel (%p2057_p11) target bundleno = 101 (0x65), region = 20 }
  0x15   : > { %s2063_s30 = scalar_select %p1747_p9, 1, 0 }
  0x16   : > { %s2064_s6 = scalar_select %p1751_p10, 1, 0 }
  0x19   : > { %195 = sbr.rel (!%p1738_p5) target bundleno = 39 (0x27), region = 24  ;;  %s197_s7 = sand.u32 (%p1738_p5), 1, %s1650_s20  }
  0x1a   : > { %s1192_s8 = sshll.u32 (%p1738_p5), %s1654_s21, 3  ;;  %s1191_s9 = sshll.u32 (%p1738_p5), %s197_s7, 6 }
  0x1b   : > { %s2065_s0 = sld [smem:[#allocation14_spill]] (%p1738_p5)  ;;  %s199_s13 = scalar_lea.vmem (%p1738_p5), [#allocation3], %s1191_s9 }
  0x21   : > { %s201_s12 = scalar_lea.vmem %s2065_s0, %s1192_s8 }
  0x22   : > { %v244_v0 = vld [vmem:[%s201_s12] sm:$0xff]  ;;  %v246_v1 = vld [vmem:[%s201_s12 + $0x10] sm:$0xff] }
  0x23   : > { %v248_v2 = vld [vmem:[%s201_s12 + $0x20] sm:$0xff]  ;;  %245 = vst [vmem:[%s199_s13] sm:$0xff] %v244_v0  ;;  %247 = vst [vmem:[%s199_s13 + $0x8] sm:$0xff] %v246_v1  ;;  %v250_v3 = vld [vmem:[%s201_s12 + $0x30] sm:$0xff] }
  0x24   : > { %249 = vst [vmem:[%s199_s13 + $0x10] sm:$0xff] %v248_v2  ;;  %v252_v4 = vld [vmem:[%s201_s12 + $0x40] sm:$0xff]  ;;  %v254_v5 = vld [vmem:[%s201_s12 + $0x50] sm:$0xff]  ;;  %251 = vst [vmem:[%s199_s13 + $0x18] sm:$0xff] %v250_v3 }
  0x25   : > { %253 = vst [vmem:[%s199_s13 + $0x20] sm:$0xff] %v252_v4  ;;  %255 = vst [vmem:[%s199_s13 + $0x28] sm:$0xff] %v254_v5  ;;  %v256_v6 = vld [vmem:[%s201_s12 + $0x60] sm:$0xff]  ;;  %v258_v7 = vld [vmem:[%s201_s12 + $0x70] sm:$0xff] }
  0x26   : > { %257 = vst [vmem:[%s199_s13 + $0x30] sm:$0xff] %v256_v6  ;;  %259 = vst [vmem:[%s199_s13 + $0x38] sm:$0xff] %v258_v7 }
  0x27 PF: > { %265 = sbr.rel (!%p1738_p5) target bundleno = 53 (0x35), region = 62  ;;  %s267_s14 = sand.u32 (%p1738_p5), 1, %s1650_s20  }
  0x28   : > { %s1194_s15 = sshll.u32 (%p1738_p5), %s1654_s21, 3  ;;  %s1193_s16 = sshll.u32 (%p1738_p5), %s267_s14, 6 }
  0x29   : > { %s2066_s1 = sld [smem:[#allocation15_spill]] (%p1738_p5)  ;;  %s269_s26 = scalar_lea.vmem (%p1738_p5), [#allocation4], %s1193_s16 }
  0x2f   : > { %s271_s25 = scalar_lea.vmem %s2066_s1, %s1194_s15 }
  0x30   : > { %v314_v8 = vld [vmem:[%s271_s25] sm:$0xff]  ;;  %v316_v9 = vld [vmem:[%s271_s25 + $0x10] sm:$0xff] }
  0x31   : > { %v318_v10 = vld [vmem:[%s271_s25 + $0x20] sm:$0xff]  ;;  %315 = vst [vmem:[%s269_s26] sm:$0xff] %v314_v8  ;;  %317 = vst [vmem:[%s269_s26 + $0x8] sm:$0xff] %v316_v9  ;;  %v320_v11 = vld [vmem:[%s271_s25 + $0x30] sm:$0xff] }
  0x32   : > { %319 = vst [vmem:[%s269_s26 + $0x10] sm:$0xff] %v318_v10  ;;  %v322_v12 = vld [vmem:[%s271_s25 + $0x40] sm:$0xff]  ;;  %v324_v13 = vld [vmem:[%s271_s25 + $0x50] sm:$0xff]  ;;  %321 = vst [vmem:[%s269_s26 + $0x18] sm:$0xff] %v320_v11 }
  0x33   : > { %323 = vst [vmem:[%s269_s26 + $0x20] sm:$0xff] %v322_v12  ;;  %325 = vst [vmem:[%s269_s26 + $0x28] sm:$0xff] %v324_v13  ;;  %v326_v14 = vld [vmem:[%s271_s25 + $0x60] sm:$0xff]  ;;  %v328_v15 = vld [vmem:[%s271_s25 + $0x70] sm:$0xff] }
  0x34   : > { %327 = vst [vmem:[%s269_s26 + $0x30] sm:$0xff] %v326_v14  ;;  %329 = vst [vmem:[%s269_s26 + $0x38] sm:$0xff] %v328_v15 }
  0x35 PF: > { %s1773_s7 = sand.u32 1, %s1650_s20   ;;  %s1196_s8 = sshll.u32 %s1654_s21, 7 }
  0x36   : > { %s1195_s9 = sshll.u32 %s1773_s7, 5  ;;  %s1782_s12 = scalar_lea.hbm %s2053_s2, %s1196_s8 }
  0x37   : > { %s340_s13 = scalar_lea.vmem [#allocation5], %s1195_s9  ;;  %s337_s15 = scalar_lea.sflag [#allocation6], %s1773_s7 }
  0x38   : > { %s346_s14 = sshll.u32 %s340_s13, 4  ;;  %s1534_s16 = scalar_lea.hbm %s1782_s12, 512  ;;  %s1786_s14 = int_to_ptr.vmem [resolvable:$true] %s346_s14 }
  0x39   : > { %p1535_p12 = scmp.ne.s32.totalorder %s1782_s12, %s1534_s16  ;;  %s1538_s25 = scalar_lea.hbm %s2053_s2, 1024 }
  0x3a   : > { %p1539_p1 = scmp.lt.s32.totalorder %s1782_s12, %s2053_s2  ;;  %p1540_p2 = scmp.lt.s32.totalorder %s1538_s25, %s1534_s16 }
  0x3b   : > { %p1536_p13 = pnand %p1535_p12, %p1738_p5 }
  0x3c   : > { %p1541_p3 = por %p1540_p2, %p1539_p1 }
  0x3d   : > { %p1537_p0 = pneg %p1536_p13 }
  0x3f   : > { %p1542_p4 = pnand %p1541_p3, %p1537_p0 }
  0x41   : > { %1545 = shalt.err (!%p1542_p4)
}
  0x42   : > { %s1546_s11 = scalar_lea.vmem %s1786_s14, 512  ;;  %s1656_s13 = smov [#allocation5]  }
  0x43   : > { %p1547_p7 = scmp.ne.s32.totalorder %s1786_s14, %s1546_s11  ;;  %s1550_s17 = sshll.u32 %s1656_s13, 4  ;;  %s1551_s17 = int_to_ptr.vmem [resolvable:$false] %s1550_s17 }
  0x44   : > { %s1552_s23 = scalar_lea.vmem %s1551_s17, 1024  ;;  %p1553_p13 = scmp.lt.s32.totalorder %s1786_s14, %s1551_s17 }
  0x45   : > { %p1548_p8 = pnand %p1547_p7, %p1738_p5  ;;  %p1554_p11 = scmp.lt.s32.totalorder %s1552_s23, %s1546_s11 }
  0x47   : > { %p1549_p12 = pneg %p1548_p8  ;;  %p1555_p10 = por %p1554_p11, %p1553_p13 }
  0x49   : > { %p1556_p9 = pnand %p1555_p10, %p1549_p12 }
  0x4b   : > { %1559 = shalt.err (!%p1556_p9)
}
  0x4c   : > { %s1657_s16 = smov 256   ;;  %s1658_s25 = smov 128  }
  0x4d   : > { %s1659_s26 = smov 8   ;;  %s1819_s13 = scalar_lea.hbm %s2054_s3, %s1196_s8 }
  0x4e   : > { %1362 = dma.hbm_to_vmem [thread:$0]  (%p1738_p5), %s1782_s12, 512, %s1786_s14, %s337_s15, %s1657_s16, %s1658_s25, %s1659_s26  }
  0x4f   : > { %s360_s17 = scalar_lea.vmem [#allocation8], %s1195_s9  ;;  %s357_s0 = scalar_lea.sflag [#allocation9], %s1773_s7 }
  0x50   : > { %s366_s23 = sshll.u32 %s360_s17, 4  ;;  %s1560_s1 = scalar_lea.hbm %s1819_s13, 512  ;;  %s1823_s23 = int_to_ptr.vmem [resolvable:$true] %s366_s23 }
  0x51   : > { %p1561_p9 = scmp.ne.s32.totalorder %s1819_s13, %s1560_s1  ;;  %s1564_s15 = scalar_lea.hbm %s2054_s3, 1024 }
  0x52   : > { %p1565_p0 = scmp.lt.s32.totalorder %s1819_s13, %s2054_s3  ;;  %p1566_p1 = scmp.lt.s32.totalorder %s1564_s15, %s1560_s1 }
  0x53   : > { %p1562_p10 = pnand %p1561_p9, %p1738_p5 }
  0x54   : > { %p1567_p2 = por %p1566_p1, %p1565_p0 }
  0x55   : > { %p1563_p11 = pneg %p1562_p10 }
  0x57   : > { %p1568_p3 = pnand %p1567_p2, %p1563_p11 }
  0x59   : > { %1571 = shalt.err (!%p1568_p3)
}
  0x5a   : > { %s1572_s7 = scalar_lea.vmem %s1823_s23, 512  ;;  %s1660_s9 = smov [#allocation8]  }
  0x5b   : > { %p1573_p4 = scmp.ne.s32.totalorder %s1823_s23, %s1572_s7  ;;  %s1576_s11 = sshll.u32 %s1660_s9, 4  ;;  %s1577_s11 = int_to_ptr.vmem [resolvable:$false] %s1576_s11 }
  0x5c   : > { %s1578_s17 = scalar_lea.vmem %s1577_s11, 1024  ;;  %p1579_p12 = scmp.lt.s32.totalorder %s1823_s23, %s1577_s11 }
  0x5d   : > { %p1574_p7 = pnand %p1573_p4, %p1738_p5  ;;  %p1580_p13 = scmp.lt.s32.totalorder %s1578_s17, %s1572_s7 }
  0x5f   : > { %p1575_p8 = pneg %p1574_p7  ;;  %p1581_p9 = por %p1580_p13, %p1579_p12 }
  0x61   : > { %p1582_p10 = pnand %p1581_p9, %p1575_p8 }
  0x63   : > { %1585 = shalt.err (!%p1582_p10)
}
  0x64   : > { %1363 = dma.hbm_to_vmem [thread:$0]  (%p1738_p5), %s1819_s13, 512, %s1823_s23, %s357_s0, %s1657_s16, %s1658_s25, %s1659_s26  }
  0x65 PF: > { %p1199_p11 = scmp.ge.s32.totalorder %s1654_s21, 1  ;;  %p374_p0 = scmp.lt.s32.totalorder %s1654_s21, 3 }
  0x67   : > { %p375_p1 = pnand %p1199_p11, %p374_p0 }
  0x68   : > { %s1852_s1 = sand.u32 (!%p375_p1), 1, %s1646_s19  }
  0x69   : > { %378 = sbr.rel (%p375_p1) target bundleno = 458 (0x1ca), region = 108  ;;  %s1855_s28 = sshll.u32 (!%p375_p1), %s1852_s1, 6 }
  0x6a   : > { %s1202_s12 = sshll.u32 (!%p375_p1), %s1852_s1, 5  ;;  %s1859_s0 = scalar_lea.vmem (!%p375_p1), [#allocation3], %s1855_s28 }
  0x6b   : > { %s1862_s16 = scalar_lea.vmem (!%p375_p1), [#allocation4], %s1855_s28  ;;  %s395_s25 = scalar_lea.sflag (!%p375_p1), [#allocation6], %s1852_s1 }
  0x6c   : > { %s1865_s26 = scalar_lea.vmem (!%p375_p1), [#allocation5], %s1202_s12 }
  0x6e   : > { %1629 = dma.done.wait (%p1742_p6), %s395_s25, 512  }
  0x6f   : > { %1631 = vsyncadd (%p1742_p6), %s395_s25, 4294966784  ;;  %s404_s13 = scalar_lea.sflag [#allocation9], %s1852_s1  ;;  %s407_s23 = scalar_lea.vmem [#allocation8], %s1202_s12 }
  0x70   : > { %1633 = dma.done.wait (%p1742_p6), %s404_s13, 512  }
  0x71   : > { %1635 = vsyncadd (%p1742_p6), %s404_s13, 4294966784  ;;  %v544_v16 = vlaneseq  ;;  %v1661_v17 = vmov 0   ;;  %v1662_v18 = vmov 839922192   ;;  %v1663_v21 = vmov 1985246804  }
  0x72   : > { %786 = vmatprep.subr.bf16.mxu0 %v1661_v17  ;;  %1344 = vmatprep.subr.bf16.mxu1 %v1661_v17  ;;  %v556_v19 = vunpack.c.l.s4 %v1662_v18  ;;  %v563_v22 = vunpack.c.l.s4 %v1663_v21  ;;  %v1664_v25 = vmov 0.0   ;;  %v522_v30 = vld [vmem:[%s407_s23 + $0x10] sm:$0xff]  ;;  %v523_v31 = vld [vmem:[%s407_s23 + $0x18] sm:$0xff]  ;;  %v520_v32 = vld [vmem:[%s407_s23] sm:$0xff]  ;;  %vm755_vm1 = vcmask 130048   ;;  %s1988_s13 = scalar_lea.vmem [#allocation10], %s1855_s28 }
  0x73   : > { %v545_v20 = vshrl.u32 %v544_v16, 7  ;;  %v1335_v33 = vpack.c.bf16 %v523_v31, %v522_v30  ;;  %v521_v34 = vld [vmem:[%s407_s23 + $0x8] sm:$0xff]  ;;  %v498_v35 = vld [vmem:[%s1865_s26 + $0x10] sm:$0xff]  ;;  %v499_v36 = vld [vmem:[%s1865_s26 + $0x18] sm:$0xff]  ;;  %s1278_s28 = sshll.u32 %s1720_s22, 7  ;;  %s1044_s14 = scalar_lea.sflag [#allocation7], %s1852_s1 }
  0x74   : > { %v557_v23 = vunpack.c.0.s8 %v556_v19  ;;  %v564_v24 = vunpack.c.0.s8 %v563_v22  ;;  %v1330_v39 = vpack.c.bf16 %v521_v34, %v520_v32  ;;  %v1325_v40 = vpack.c.bf16 %v499_v36, %v498_v35  ;;  %v496_v41 = vld [vmem:[%s1865_s26] sm:$0xff]  ;;  %v497_v42 = vld [vmem:[%s1865_s26 + $0x8] sm:$0xff]  ;;  %v474_v43 = vld [vmem:[%s1862_s16 + $0x10] sm:$0xff]  ;;  %s2005_s29 = scalar_lea.hbm %s2056_s5, %s1278_s28  ;;  %p2067_p6 = scmp.ne.s32.totalorder %s2063_s30, 0 }
  0x75   : > { %vm547_vm0 = vcmp.eq.s32.totalorder %v545_v20, 0  ;;  %1343 = vst [vmem:[#allocation2 + $0x38] sm:$0xff] %v1335_v33   ;;  %v1320_v44 = vpack.c.bf16 %v497_v42, %v496_v41  ;;  %v475_v45 = vld [vmem:[%s1862_s16 + $0x18] sm:$0xff]  ;;  %v472_v46 = vld [vmem:[%s1862_s16] sm:$0xff]  ;;  %v473_v47 = vld [vmem:[%s1862_s16 + $0x8] sm:$0xff]  ;;  %s1665_s22 = smov [#allocation10]  }
  0x76   : > { %v1221_v26 = vsel %vm547_vm0, 1.0, %v1664_v25  ;;  %v560_v27 = vsub.s32 %v557_v23, %v545_v20  ;;  %v567_v29 = vsub.s32 %v564_v24, %v545_v20  ;;  %1342 = vst [vmem:[#allocation2 + $0x30] sm:$0xff] %v1330_v39   ;;  %1341 = vst [vmem:[#allocation2 + $0x28] sm:$0xff] %v1325_v40   ;;  %v1315_v48 = vpack.c.bf16 %v475_v45, %v474_v43  ;;  %v450_v50 = vld [vmem:[%s1859_s0 + $0x10] sm:$0xff]  ;;  %v451_v51 = vld [vmem:[%s1859_s0 + $0x18] sm:$0xff]  ;;  %s1590_s8 = sshll.u32 %s1665_s22, 4  ;;  %s1591_s8 = int_to_ptr.vmem [resolvable:$false] %s1590_s8 }
  0x77   : > { %v553_v28 = vpack.c.bf16 %v1664_v25, %v1221_v26  ;;  %v1310_v49 = vpack.c.bf16 %v473_v47, %v472_v46  ;;  %v448_v52 = vld [vmem:[%s1859_s0] sm:$0xff]  ;;  %1340 = vst [vmem:[#allocation2 + $0x20] sm:$0xff] %v1320_v44   ;;  %v1305_v53 = vpack.c.bf16 %v451_v51, %v450_v50  ;;  %v449_v54 = vld [vmem:[%s1859_s0 + $0x8] sm:$0xff]  ;;  %s1592_s10 = scalar_lea.vmem %s1591_s8, 2048 }
  0x78   : > { %1339 = vst [vmem:[#allocation2 + $0x18] sm:$0xff] %v1315_v48   ;;  %v1300_v55 = vpack.c.bf16 %v449_v54, %v448_v52  ;;  %v1426_v56 = vld [vmem:[%s2055_s4 + $0x4] ss:$8 sps:$4 sm:$0xff]   ;;  %v1432_v57 = vld [vmem:[%s2055_s4 + $0x54] ss:$8 sps:$4 sm:$0xff]  }
  0x79   : > { %v561_v37 = vrot.slane %v553_v28, %v560_v27  ;;  %v568_v38 = vrot.slane %v553_v28, %v567_v29  ;;  %1338 = vst [vmem:[#allocation2 + $0x10] sm:$0xff] %v1310_v49   ;;  %1337 = vst [vmem:[#allocation2 + $0x8] sm:$0xff] %v1305_v53   ;;  %1251 = vmatprep.mubr.msk.bf16.mxu0 %vm755_vm1, %v1426_v56  ;;  %1256 = vmatprep.mubr.msk.bf16.mxu1 %vm755_vm1, %v1432_v57  ;;  %v1424_v3 = vld [vmem:[%s2055_s4] ss:$8 sps:$4 sm:$0xff]   ;;  %v1430_v4 = vld [vmem:[%s2055_s4 + $0x50] ss:$8 sps:$4 sm:$0xff]  }
  0x7a   : > { %1301 = vst [vmem:[#allocation2] sm:$0xff] %v1300_v55   ;;  %v1427_v5 = vld [vmem:[%s2055_s4 + $0x14] ss:$8 sps:$4 sm:$0xff]   ;;  %v1436_v6 = vld [vmem:[%s2055_s4 + $0x64] ss:$8 sps:$4 sm:$0xff]  }
  0x7b   : > { %571 = vst [vmem:[#allocation2 + $0x40] sm:$0xf] %v561_v37  ;;  %572 = vst [vmem:[#allocation2 + $0x44] sm:$0xf] %v568_v38  ;;  %v1429_v7 = vld [vmem:[%s2055_s4 + $0x10] ss:$8 sps:$4 sm:$0xff]  }
  0x7c   : > { %v1415_v58 = vld [vmem:[#allocation2 + $0x38] sm:$0xff]   ;;  %v1438_v8 = vld [vmem:[%s2055_s4 + $0x60] ss:$8 sps:$4 sm:$0xff]   ;;  %v1433_v9 = vld [vmem:[%s2055_s4 + $0x24] ss:$8 sps:$4 sm:$0xff]  }
  0x7d   : > { %787 = vmatpush1.bf16.msra.mxu0 %v1415_v58  ;;  %v1416_v59 = vld [vmem:[#allocation2 + $0x30] sm:$0xff]   ;;  %1353 = vmatpush1.bf16.msra.mxu1 %v1415_v58  ;;  %v1417_v60 = vld [vmem:[#allocation2 + $0x28] sm:$0xff]  }
  0x7e   : > { %788 = vmatprep.subr.bf16.mxu0 %v1661_v17  ;;  %1345 = vmatprep.subr.bf16.mxu1 %v1661_v17  ;;  %v1418_v61 = vld [vmem:[#allocation2 + $0x20] sm:$0xff]   ;;  %v1442_v10 = vld [vmem:[%s2055_s4 + $0x74] ss:$8 sps:$4 sm:$0xff]   ;;  %v1444_v12 = vld [vmem:[%s2055_s4 + $0x70] ss:$8 sps:$4 sm:$0xff]  }
  0x7f   : > { %v1419_v62 = vld [vmem:[#allocation2 + $0x18] sm:$0xff]   ;;  %v1435_v11 = vld [vmem:[%s2055_s4 + $0x20] ss:$8 sps:$4 sm:$0xff]   ;;  %v1448_v14 = vld [vmem:[%s2055_s4 + $0x84] ss:$8 sps:$4 sm:$0xff]  }
  0x80   : > { %v1420_v63 = vld [vmem:[#allocation2 + $0x10] sm:$0xff]   ;;  %v1421_v0 = vld [vmem:[#allocation2 + $0x8] sm:$0xff]  }
  0x81   : > { %789 = vmatpush1.bf16.msra.mxu0 %v1416_v59  ;;  %1354 = vmatpush1.bf16.msra.mxu1 %v1416_v59  ;;  %v1422_v1 = vld [vmem:[#allocation2] sm:$0xff]   ;;  %v1439_v13 = vld [vmem:[%s2055_s4 + $0x34] ss:$8 sps:$4 sm:$0xff]   ;;  %v1441_v15 = vld [vmem:[%s2055_s4 + $0x30] ss:$8 sps:$4 sm:$0xff]  }
  0x82   : > { %790 = vmatprep.subr.bf16.mxu0 %v1661_v17  ;;  %1346 = vmatprep.subr.bf16.mxu1 %v1661_v17  ;;  %v1423_v2 = vld [vmem:[#allocation2 + $0x40] sm:$0xff]   ;;  %v1451_v18 = vld [vmem:[%s2055_s4 + $0x94] ss:$8 sps:$4 sm:$0xff]   ;;  %v1453_v20 = vld [vmem:[%s2055_s4 + $0x90] ss:$8 sps:$4 sm:$0xff]  }
  0x83   : > { %v1450_v16 = vld [vmem:[%s2055_s4 + $0x80] ss:$8 sps:$4 sm:$0xff]  }
  0x84   : > { %v1447_v19 = vld [vmem:[%s2055_s4 + $0x40] ss:$8 sps:$4 sm:$0xff]  }
  0x85   : > { %791 = vmatpush1.bf16.msra.mxu0 %v1417_v60  ;;  %1355 = vmatpush1.bf16.msra.mxu1 %v1417_v60 }
  0x86   : > { %792 = vmatprep.subr.bf16.mxu0 %v1661_v17  ;;  %1347 = vmatprep.subr.bf16.mxu1 %v1661_v17 }
  0x89   : > { %793 = vmatpush1.bf16.msra.mxu0 %v1418_v61  ;;  %1356 = vmatpush1.bf16.msra.mxu1 %v1418_v61 }
  0x8a   : > { %794 = vmatprep.subr.bf16.mxu0 %v1661_v17  ;;  %1348 = vmatprep.subr.bf16.mxu1 %v1661_v17 }
  0x8d   : > { %795 = vmatpush1.bf16.msra.mxu0 %v1419_v62  ;;  %1357 = vmatpush1.bf16.msra.mxu1 %v1419_v62 }
  0x8e   : > { %796 = vmatprep.subr.bf16.mxu0 %v1661_v17  ;;  %1349 = vmatprep.subr.bf16.mxu1 %v1661_v17 }
  0x91   : > { %797 = vmatpush1.bf16.msra.mxu0 %v1420_v63  ;;  %1358 = vmatpush1.bf16.msra.mxu1 %v1420_v63 }
  0x92   : > { %798 = vmatprep.subr.bf16.mxu0 %v1661_v17  ;;  %1350 = vmatprep.subr.bf16.mxu1 %v1661_v17 }
  0x95   : > { %799 = vmatpush1.bf16.msra.mxu0 %v1421_v0  ;;  %1359 = vmatpush1.bf16.msra.mxu1 %v1421_v0 }
  0x96   : > { %800 = vmatprep.subr.bf16.mxu0 %v1661_v17  ;;  %1351 = vmatprep.subr.bf16.mxu1 %v1661_v17 }
  0x99   : > { %801 = vmatpush1.bf16.msra.mxu0 %v1422_v1  ;;  %1360 = vmatpush1.bf16.msra.mxu1 %v1422_v1 }
  0x9a   : > { %816 = vmatprep.subr.bf16.mxu0 %v1661_v17  ;;  %1352 = vmatprep.subr.bf16.mxu1 %v1661_v17  ;;  %v1445_v17 = vld [vmem:[%s2055_s4 + $0x44] ss:$8 sps:$4 sm:$0xff]  }
  0x9d   : > { %817 = vmatpush2.bf16.msra.mxu0 %v1423_v2  ;;  %1361 = vmatpush2.bf16.msra.mxu1 %v1423_v2 }
  0xa0   : > { %819 = vmatmul.mubr.bf16.vlgmr.msra.gmra.mxu0 %v1424_v3  ;;  %859 = vmatmul.mubr.bf16.vlgmr.msra.gmra.mxu1 %v1430_v4 }
  0xa1   : > { %1252 = vmatprep.mubr.msk.bf16.mxu0 %vm755_vm1, %v1427_v5  ;;  %1257 = vmatprep.mubr.msk.bf16.mxu1 %vm755_vm1, %v1436_v6 }
  0xa8   : > { %827 = vmatmul.mubr.bf16.gmra.mxu0 %v1429_v7  ;;  %867 = vmatmul.mubr.bf16.gmra.mxu1 %v1438_v8 }
  0xa9   : > { %1253 = vmatprep.mubr.msk.bf16.mxu0 %vm755_vm1, %v1433_v9  ;;  %1258 = vmatprep.mubr.msk.bf16.mxu1 %vm755_vm1, %v1442_v10 }
  0xb0   : > { %835 = vmatmul.mubr.bf16.gmra.mxu0 %v1435_v11  ;;  %875 = vmatmul.mubr.bf16.gmra.mxu1 %v1444_v12 }
  0xb1   : > { %1254 = vmatprep.mubr.msk.bf16.mxu0 %vm755_vm1, %v1439_v13  ;;  %1259 = vmatprep.mubr.msk.bf16.mxu1 %vm755_vm1, %v1448_v14 }
  0xb8   : > { %843 = vmatmul.mubr.bf16.gmra.mxu0 %v1441_v15  ;;  %883 = vmatmul.mubr.bf16.gmra.mxu1 %v1450_v16 }
  0xb9   : > { %1255 = vmatprep.mubr.msk.bf16.mxu0 %vm755_vm1, %v1445_v17  ;;  %1260 = vmatprep.mubr.msk.bf16.mxu1 %vm755_vm1, %v1451_v18 }
  0xc0   : > { %851 = vmatmul.mubr.bf16.gmra.mxu0 %v1447_v19  ;;  %891 = vmatmul.mubr.bf16.gmra.mxu1 %v1453_v20 }
 0x160   : > { %v820_v21 = vpop.f32.mrf.mxu0  ;;  %v860_v22 = vpop.f32.mrf.mxu1 }
 0x161   : > { %v1267_v37 = vmul.f32 -1.442695, %v860_v22 }
 0x162   : > { %v822_v23 = vpop.f32.mrf.mxu0  ;;  %v862_v24 = vpop.f32.mrf.mxu1 }
 0x163   : > { %1454 = vpow2.f32 %v1267_v37 }
 0x164   : > { %v823_v25 = vpop.f32.mrf.mxu0  ;;  %v863_v26 = vpop.f32.mrf.mxu1 }
 0x165   : > { %v1268_v43 = vmul.f32 -1.442695, %v863_v26 }
 0x166   : > { %v825_v27 = vpop.f32.mrf.mxu0  ;;  %v865_v28 = vpop.f32.mrf.mxu1 }
 0x168   : > { %v828_v29 = vpop.f32.mrf.mxu0  ;;  %v868_v30 = vpop.f32.mrf.mxu1 }
 0x169   : > { %v1269_v49 = vmul.f32 -1.442695, %v868_v30 }
 0x16a   : > { %v830_v31 = vpop.f32.mrf.mxu0  ;;  %v870_v32 = vpop.f32.mrf.mxu1 }
 0x16c   : > { %v831_v33 = vpop.f32.mrf.mxu0  ;;  %v871_v34 = vpop.f32.mrf.mxu1 }
 0x16d   : > { %v1270_v56 = vmul.f32 -1.442695, %v871_v34 }
 0x16e   : > { %v833_v35 = vpop.f32.mrf.mxu0  ;;  %v873_v36 = vpop.f32.mrf.mxu1 }
 0x170   : > { %v836_v38 = vpop.f32.mrf.mxu0  ;;  %v876_v39 = vpop.f32.mrf.mxu1 }
 0x171   : > { %v1271_v41 = vmul.f32 -1.442695, %v876_v39  ;;  %v1261_v52 = vmul.f32 -1.442695, %v836_v38  ;;  %v1455_v1 = vpop.eup %1454 }
 0x172   : > { %v838_v40 = vpop.f32.mrf.mxu0  ;;  %v878_v42 = vpop.f32.mrf.mxu1  ;;  %v953_v7 = vadd.f32 1.0, %v1455_v1 }
 0x173   : > { %1456 = vpow2.f32 %v1271_v41 }
 0x174   : > { %v839_v44 = vpop.f32.mrf.mxu0  ;;  %v879_v45 = vpop.f32.mrf.mxu1  ;;  %1458 = vpow2.f32 %v1268_v43 }
 0x175   : > { %v1272_v46 = vmul.f32 -1.442695, %v879_v45  ;;  %v1262_v59 = vmul.f32 -1.442695, %v839_v44  ;;  %v901_v44 = vld [vmem:[%s1859_s0 + $0x30] sm:$0xff] }
 0x176   : > { %v841_v47 = vpop.f32.mrf.mxu0  ;;  %v881_v48 = vpop.f32.mrf.mxu1  ;;  %v905_v45 = vld [vmem:[%s1862_s16 + $0x30] sm:$0xff] }
 0x177   : > { %1460 = vpow2.f32 %v1272_v46 }
 0x178   : > { %v844_v50 = vpop.f32.mrf.mxu0  ;;  %v884_v51 = vpop.f32.mrf.mxu1  ;;  %1462 = vpow2.f32 %v1269_v49 }
 0x179   : > { %v1263_v53 = vmul.f32 -1.442695, %v844_v50 }
 0x17a   : > { %v846_v54 = vpop.f32.mrf.mxu0  ;;  %v886_v55 = vpop.f32.mrf.mxu1 }
 0x17b   : > { %1464 = vpow2.f32 %v1263_v53  ;;  %v906_v55 = vld [vmem:[%s1862_s16 + $0x38] sm:$0xff] }
 0x17c   : > { %v847_v57 = vpop.f32.mrf.mxu0  ;;  %v1976_v58 = vpop.f32.mrf.mxu1  ;;  %1466 = vpow2.f32 %v1261_v52 }
 0x17d   : > { %v1264_v60 = vmul.f32 -1.442695, %v847_v57  ;;  %1468 = vpow2.f32 %v1270_v56  ;;  %v1274_v37 = vmul.f32 -1.442695, %v1976_v58 }
 0x17e   : > { %v849_v61 = vpop.f32.mrf.mxu0  ;;  %v889_v62 = vpop.f32.mrf.mxu1 }
 0x17f   : > { %1470 = vpow2.f32 %v1264_v60 }
 0x180   : > { %v852_v63 = vpop.f32.mrf.mxu0  ;;  %v892_v0 = vpop.f32.mrf.mxu1  ;;  %1472 = vpow2.f32 %v1262_v59 }
 0x181   : > { %v1265_v2 = vmul.f32 -1.442695, %v852_v63  ;;  %1474 = vtanh.f32 %v820_v21  ;;  %v1457_v5 = vpop.eup %1456  ;;  %v1275_v11 = vmul.f32 -1.442695, %v892_v0  ;;  %v899_v0 = vld [vmem:[%s1859_s0 + $0x20] sm:$0xff] }
 0x182   : > { %v854_v3 = vpop.f32.mrf.mxu0  ;;  %v894_v4 = vpop.f32.mrf.mxu1  ;;  %v985_v13 = vadd.f32 1.0, %v1457_v5 }
 0x183   : > { %1476 = vpow2.f32 %v1265_v2  ;;  %v1459_v6 = vpop.eup %1458  ;;  %v903_v4 = vld [vmem:[%s1862_s16 + $0x20] sm:$0xff] }
 0x184   : > { %1478 = vtanh.f32 %v823_v25  ;;  %v855_v8 = vpop.f32.mrf.mxu0  ;;  %v895_v9 = vpop.f32.mrf.mxu1  ;;  %v954_v16 = vadd.f32 1.0, %v1459_v6 }
 0x185   : > { %1480 = vtanh.f32 %v828_v29  ;;  %v1266_v10 = vmul.f32 -1.442695, %v855_v8  ;;  %v1461_v12 = vpop.eup %1460  ;;  %v1276_v22 = vmul.f32 -1.442695, %v895_v9  ;;  %v1273_v29 = vmul.f32 -1.442695, %v884_v51 }
 0x186   : > { %1482 = vtanh.f32 %v831_v33  ;;  %v857_v14 = vpop.f32.mrf.mxu0  ;;  %v897_v15 = vpop.f32.mrf.mxu1  ;;  %v986_v19 = vadd.f32 1.0, %v1461_v12  ;;  %v902_v51 = vld [vmem:[%s1859_s0 + $0x38] sm:$0xff] }
 0x187   : > { %1484 = vpow2.f32 %v1266_v10  ;;  %v1463_v17 = vpop.eup %1462 }
 0x188   : > { %1486 = vrcp.f32 %v953_v7  ;;  %v1465_v18 = vpop.eup %1464  ;;  %v983_v23 = vadd.f32 1.0, %v1463_v17  ;;  %v904_v17 = vld [vmem:[%s1862_s16 + $0x28] sm:$0xff] }
 0x189   : > { %1488 = vpow2.f32 %v1275_v11  ;;  %v1467_v20 = vpop.eup %1466  ;;  %v925_v21 = vadd.f32 1.0, %v1465_v18  ;;  %v900_v11 = vld [vmem:[%s1859_s0 + $0x28] sm:$0xff]  ;;  %s1056_s0 = sshll.u32 %s1988_s13, 4  ;;  %s2007_s0 = int_to_ptr.vmem [resolvable:$true] %s1056_s0 }
 0x18a   : > { %1490 = vrcp.f32 %v985_v13  ;;  %v1469_v24 = vpop.eup %1468  ;;  %v923_v26 = vadd.f32 1.0, %v1467_v20  ;;  %s1586_s15 = scalar_lea.vmem %s2007_s0, 1024  ;;  %p1593_p4 = scmp.lt.s32.totalorder %s2007_s0, %s1591_s8 }
 0x18b   : > { %1492 = vrcp.f32 %v954_v16  ;;  %v984_v32 = vadd.f32 1.0, %v1469_v24  ;;  %p1587_p5 = scmp.ne.s32.totalorder %s2007_s0, %s1586_s15  ;;  %p1594_p7 = scmp.lt.s32.totalorder %s1592_s10, %s1586_s15 }
 0x18c   : > { %1494 = vrcp.f32 %v925_v21  ;;  %v1471_v25 = vpop.eup %1470 }
 0x18d   : > { %1496 = vrcp.f32 %v986_v19  ;;  %v1473_v27 = vpop.eup %1472  ;;  %v926_v28 = vadd.f32 1.0, %v1471_v25  ;;  %p1588_p2 = pnand %p1587_p5, %p2067_p6  ;;  %p1595_p8 = por %p1594_p7, %p1593_p4 }
 0x18e   : > { %1498 = vpow2.f32 %v1276_v22  ;;  %v1475_v30 = vpop.eup %1474  ;;  %v924_v34 = vadd.f32 1.0, %v1473_v27 }
 0x18f   : > { %1500 = vrcp.f32 %v983_v23  ;;  %p1589_p3 = pneg %p1588_p2 }
 0x190   : > { %v1477_v31 = vpop.eup %1476  ;;  %1502 = vrcp.f32 %v926_v28 }
 0x191   : > { %v1978_v33 = vpop.eup %1478  ;;  %1504 = vrcp.f32 %v923_v26  ;;  %v951_v35 = vadd.f32 1.0, %v1477_v31  ;;  %p1596_p12 = pnand %p1595_p8, %p1589_p3 }
 0x192   : > { %v1481_v36 = vpop.eup %1480  ;;  %1506 = vpow2.f32 %v1273_v29 }
 0x193   : > { %v1483_v38 = vpop.eup %1482  ;;  %1508 = vrcp.f32 %v951_v35 }
 0x194   : > { %v1485_v39 = vpop.eup %1484  ;;  %1510 = vrcp.f32 %v984_v32 }
 0x195   : > { %v1487_v40 = vpop.eup %1486  ;;  %1512 = vrcp.f32 %v924_v34  ;;  %v952_v41 = vadd.f32 1.0, %v1485_v39 }
 0x196   : > { %v1489_v42 = vpop.eup %1488  ;;  %1514 = vpow2.f32 %v1274_v37  ;;  %v965_v50 = vmul.f32 %v1487_v40, %v901_v44 }
 0x197   : > { %v1491_v43 = vpop.eup %1490  ;;  %1516 = vrcp.f32 %v952_v41  ;;  %v1017_v48 = vadd.f32 1.0, %v1489_v42 }
 0x198   : > { %v1493_v46 = vpop.eup %1492  ;;  %v997_v53 = vmul.f32 %v1491_v43, %v905_v45 }
 0x199   : > { %v1495_v47 = vpop.eup %1494  ;;  %v966_v59 = vmul.f32 %v1493_v46, %v902_v51  ;;  %1518 = vrcp.f32 %v1017_v48 }
 0x19a   : > { %v1497_v49 = vpop.eup %1496  ;;  %v937_v52 = vmul.f32 %v1495_v47, %v1481_v36 }
 0x19b   : > { %v1499_v54 = vpop.eup %1498  ;;  %v998_v63 = vmul.f32 %v1497_v49, %v906_v55 }
 0x19c   : > { %v1501_v56 = vpop.eup %1500  ;;  %v969_v57 = vadd.f32 %v965_v50, %v937_v52  ;;  %v1018_v1 = vadd.f32 1.0, %v1499_v54 }
 0x19d   : > { %v1503_v58 = vpop.eup %1502  ;;  %v995_v14 = vmul.f32 %v1501_v56, %v903_v4 }
 0x19e   : > { %v1505_v60 = vpop.eup %1504  ;;  %v1001_v61 = vadd.f32 %v997_v53, %v969_v57  ;;  %v938_v62 = vmul.f32 %v1503_v58, %v1483_v38 }
 0x19f   : > { %v1507_v2 = vpop.eup %1506  ;;  %v935_v7 = vmul.f32 %v1505_v60, %v1475_v30 }
 0x1a0   : > { %v1509_v3 = vpop.eup %1508  ;;  %1520 = vtanh.f32 %v1001_v61  ;;  %1041 = vst [vmem:[%s1988_s13 + $0x30] sm:$0xff] %v1001_v61  ;;  %v970_v5 = vadd.f32 %v966_v59, %v938_v62  ;;  %v1015_v12 = vadd.f32 1.0, %v1507_v2 }
 0x1a1   : > { %v1511_v6 = vpop.eup %1510  ;;  %v963_v8 = vmul.f32 %v1509_v3, %v899_v0  ;;  %1522 = vrcp.f32 %v1018_v1 }
 0x1a2   : > { %v1513_v9 = vpop.eup %1512  ;;  %v1002_v10 = vadd.f32 %v998_v63, %v970_v5  ;;  %v996_v22 = vmul.f32 %v1511_v6, %v904_v17 }
 0x1a3   : > { %v1515_v13 = vpop.eup %1514  ;;  %v967_v15 = vadd.f32 %v963_v8, %v935_v7  ;;  %v936_v18 = vmul.f32 %v1513_v9, %v1978_v33 }
 0x1a4   : > { %v1517_v16 = vpop.eup %1516  ;;  %1524 = vtanh.f32 %v1002_v10  ;;  %1042 = vst [vmem:[%s1988_s13 + $0x38] sm:$0xff] %v1002_v10  ;;  %v1016_v21 = vadd.f32 1.0, %v1515_v13 }
 0x1a5   : > { %v999_v19 = vadd.f32 %v995_v14, %v967_v15  ;;  %v964_v20 = vmul.f32 %v1517_v16, %v900_v11  ;;  %1526 = vrcp.f32 %v1015_v12 }
 0x1a6   : > { %v1519_v25 = vpop.eup %1518 }
 0x1a7   : > { %1528 = vtanh.f32 %v999_v19  ;;  %1039 = vst [vmem:[%s1988_s13 + $0x20] sm:$0xff] %v999_v19  ;;  %v968_v23 = vadd.f32 %v964_v20, %v936_v18 }
 0x1a8   : > { %1530 = vrcp.f32 %v1016_v21 }
 0x1a9   : > { %v1000_v24 = vadd.f32 %v996_v22, %v968_v23 }
 0x1ab   : > { %1532 = vtanh.f32 %v1000_v24  ;;  %1040 = vst [vmem:[%s1988_s13 + $0x28] sm:$0xff] %v1000_v24 }
 0x1ad   : > { %v1521_v26 = vpop.eup %1520 }
 0x1ae   : > { %v1033_v27 = vmul.f32 %v1521_v26, %v1519_v25  ;;  %v1523_v28 = vpop.eup %1522 }
 0x1b0   : > { %1037 = vst [vmem:[%s1988_s13 + $0x10] sm:$0xff] %v1033_v27 }
 0x1b1   : > { %v1525_v29 = vpop.eup %1524 }
 0x1b2   : > { %v1034_v30 = vmul.f32 %v1525_v29, %v1523_v28  ;;  %v1527_v31 = vpop.eup %1526 }
 0x1b4   : > { %v1529_v32 = vpop.eup %1528  ;;  %1038 = vst [vmem:[%s1988_s13 + $0x18] sm:$0xff] %v1034_v30 }
 0x1b5   : > { %v1031_v33 = vmul.f32 %v1529_v32, %v1527_v31  ;;  %v1531_v34 = vpop.eup %1530 }
 0x1b7   : > { %1035 = vst [vmem:[%s1988_s13] sm:$0xff] %v1031_v33 }
 0x1b8   : > { %v1533_v35 = vpop.eup %1532 }
 0x1b9   : > { %v1032_v36 = vmul.f32 %v1533_v35, %v1531_v34 }
 0x1bb   : > { %1036 = vst [vmem:[%s1988_s13 + $0x8] sm:$0xff] %v1032_v36 }
 0x1bc   : > { %1599 = shalt.err (!%p1596_p12)
}
 0x1bd   : > { %s1600_s7 = scalar_lea.hbm %s2005_s29, 1024  ;;  %s1604_s17 = scalar_lea.hbm %s2056_s5, 2048 }
 0x1be   : > { %p1601_p13 = scmp.ne.s32.totalorder %s2005_s29, %s1600_s7  ;;  %p1605_p11 = scmp.lt.s32.totalorder %s2005_s29, %s2056_s5 }
 0x1bf   : > { %p1606_p0 = scmp.lt.s32.totalorder %s1604_s17, %s1600_s7 }
 0x1c0   : > { %p1602_p9 = pnand %p1601_p13, %p2067_p6 }
 0x1c1   : > { %p1607_p1 = por %p1606_p0, %p1605_p11 }
 0x1c2   : > { %p1603_p10 = pneg %p1602_p9 }
 0x1c4   : > { %p1608_p5 = pnand %p1607_p1, %p1603_p10 }
 0x1c6   : > { %1611 = shalt.err (!%p1608_p5)
}
 0x1c7   : > { %s1666_s26 = smov 128   ;;  %s1667_s13 = smov 256  }
 0x1c8   : > { %s1668_s28 = smov 8  }
 0x1c9   : > { %1366 = dma.vmem_to_hbm [thread:$0]  (%p2067_p6), %s2007_s0, 1024, %s2005_s29, %s1044_s14, %s1666_s26, %s1667_s13, %s1668_s28  }
 0x1ca PF: > { %s1071_s16 = sand.u32 1, %s1642_s18   ;;  %p2068_p2 = scmp.ne.s32.totalorder %s2064_s6, 0 }
 0x1cb   : > { %p2069_p3 = scmp.ge.s32.totalorder %s1654_s21, 2  ;;  %s1072_s23 = scalar_lea.sflag [#allocation7], %s1071_s16 }
 0x1cd   : > { %p1369_p4 = pnand %p2069_p3, %p2068_p2 }
 0x1cf   : > { %p1370_p7 = pneg %p1369_p4 }
 0x1d1   : > { %1637 = dma.done.wait (%p1370_p7), %s1072_s23, 1024  }
 0x1d2   : > { %1639 = vsyncadd (%p1370_p7), %s1072_s23, 4294966272  ;;  %p21_p8 = scmp.ge.s32.totalorder %s1724_s24, 4   ;;  %s2070_s18 = smov %s1646_s19 }
 0x1d3   : > { %s2071_s19 = smov %s1650_s20  ;;  %s2072_s20 = smov %s1736_s27 }
 0x1d4   : > { %s2073_s21 = smov %s1724_s24  ;;  %23 = sbr.rel (!%p21_p8) target bundleno = 10 (0xa), region = 190 }
 0x1d9   :  { %1077 = vsyncpa [#allocation6], 1 }
 0x1da   :  { %1079 = vsyncpa [#allocation6 + $0x1], 1 }
 0x1db   :  { %1080 = vsyncpa [#allocation9], 1 }
 0x1dc   :  { %1082 = vsyncpa [#allocation9 + $0x1], 1 }
 0x1dd   :  { %1083 = vsyncpa [#allocation7], 1 }
 0x1de   :  { %1085 = vsyncpa [#allocation7 + $0x1], 1 }

</bundles_post_ra>
